<compile_context>
chip_gen: v7x
topology: tpu7x:2x2x1
jax: 0.10.0
libtpu: 0.0.40
codegen_flags: <defaults>
</compile_context>

<pallas_src>
import functools

import jax
import jax.numpy as jnp
from jax.experimental import pallas as pl
from jax.experimental.pallas import tpu as pltpu


def _jacobian_field_kernel(x_ref, w1t_ref, b1t_ref, w2t_ref, b2t_ref,
                           w2c_ref, b2c_ref, jac_ref, flow_ref):
    # x_ref:   (1, C, TP)  pixel tile of one batch element (pixels in lanes)
    # w1t_ref: (HID, C)    b1t_ref: (HID, 1)   [biases kept in f32]
    # w2t_ref: (J, HID)    b2t_ref: (J, 1)
    # w2c_ref: (1, S, HID) per-batch cmd-folded second-layer weight
    # b2c_ref: (1, S, 1)   per-batch cmd-folded second-layer bias
    # jac_ref: (1, J, TP), flow_ref: (1, S, TP)  lane-dense outputs
    x = x_ref[0]                                                       # (C, TP)

    h = jnp.dot(w1t_ref[...], x, preferred_element_type=jnp.float32)  # (HID,TP)
    h = jnp.maximum(h + b1t_ref[...], 0.0)
    hc = h.astype(w2t_ref.dtype)

    jac = jnp.dot(w2t_ref[...], hc, preferred_element_type=jnp.float32)
    jac_ref[0] = (jac + b2t_ref[...]).astype(jac_ref.dtype)           # (J, TP)

    flow = jnp.dot(w2c_ref[0], hc, preferred_element_type=jnp.float32)
    flow_ref[0] = (flow + b2c_ref[0]).astype(flow_ref.dtype)          # (S, TP)


def _pick_pixel_tile(total_pixels, tile_pixels, batch):
    """Largest multiple-of-128 divisor of P that is <= tile_pixels (or full P)."""
    if total_pixels <= tile_pixels:
        tp = total_pixels
    else:
        tp = None
        cand = (tile_pixels // 128) * 128
        while cand >= 128:
            if total_pixels % cand == 0:
                tp = cand
                break
            cand -= 128
        if tp is None:
            # TODO(synk): masked last tile for pixel counts with no 128-multiple divisor.
            tp = total_pixels
    # v7x has 2 TensorCores: expose >= 2 parallel grid iterations when possible.
    if batch * (total_pixels // tp) < 2 and total_pixels % 256 == 0:
        tp = total_pixels // 2
    return tp


@functools.partial(jax.jit,
                   static_argnames=("spatial_dim", "tile_pixels",
                                    "compute_dtype", "channels_last"))
def jacobian_field_forward(input_img, input_cmd, w1, b1, w2, b2, *,
                           spatial_dim=2, tile_pixels=8192,
                           compute_dtype=jnp.bfloat16, channels_last=True):
    """input_img: (B, C, H, W) NCHW; input_cmd: (B, cmd_dim).

    Returns (jacobian, flow), channel-last by default to match
    JacobianNetOutput.  channels_last=False returns channel-first
    (B,J,H,W)/(B,S,H,W) and skips the wrapper transpose entirely.
    """
    B, C, H, W = input_img.shape
    cmd_dim = input_cmd.shape[1]
    hid = w1.shape[1]
    J = w2.shape[1]
    S = spatial_dim
    assert J == S * cmd_dim
    P = H * W

    tp = _pick_pixel_tile(P, tile_pixels, B)
    num_tiles = P // tp
    assert num_tiles * tp == P

    # NCHW is already channels-major / pixels-minor: just flatten H,W.
    x = input_img.reshape(B, C, P).astype(compute_dtype)

    # Transposed weights so the pixel axis stays in lanes in every matmul.
    w1t = jnp.transpose(w1).astype(compute_dtype)          # (HID, C)
    w2t = jnp.transpose(w2).astype(compute_dtype)          # (J, HID)
    b1t = b1.reshape(hid, 1).astype(jnp.float32)
    b2t = b2.reshape(J, 1).astype(jnp.float32)

    # Per-batch cmd-folded second layer: flow = w2c[b] @ h + b2c[b].
    cmd = input_cmd.astype(jnp.float32)
    w2r = w2.astype(jnp.float32).reshape(hid, S, cmd_dim)
    w2c = jnp.einsum("hsc,bc->bsh", w2r, cmd,
                     precision=jax.lax.Precision.HIGHEST).astype(compute_dtype)
    b2c = jnp.einsum("sc,bc->bs",
                     b2.astype(jnp.float32).reshape(S, cmd_dim), cmd,
                     precision=jax.lax.Precision.HIGHEST).reshape(B, S, 1)

    # Tight VMEM budget: double-buffered x/jac/flow tiles + resident weights,
    # plus scheduler headroom.  Always far below v7x's 64 MiB per-TC VMEM.
    x_itemsize = jnp.dtype(compute_dtype).itemsize
    tile_io_bytes = tp * (C * x_itemsize + (J + S) * 4)
    weight_bytes = 4 * (hid * C + hid + J * hid + J + B * S * hid + B * S)
    need = 2 * tile_io_bytes + weight_bytes
    vmem_limit = int(min(64 * 1024 * 1024, 2 * need + (4 << 20)))

    jac_cp, flow_cp = pl.pallas_call(
        _jacobian_field_kernel,
        out_shape=(
            jax.ShapeDtypeStruct((B, J, P), jnp.float32),
            jax.ShapeDtypeStruct((B, S, P), jnp.float32),
        ),
        grid_spec=pltpu.PrefetchScalarGridSpec(
            num_scalar_prefetch=0,
            grid=(B, num_tiles),
            in_specs=[
                pl.BlockSpec((1, C, tp), lambda b, p: (b, 0, p)),
                pl.BlockSpec((hid, C), lambda b, p: (0, 0)),
                pl.BlockSpec((hid, 1), lambda b, p: (0, 0)),
                pl.BlockSpec((J, hid), lambda b, p: (0, 0)),
                pl.BlockSpec((J, 1), lambda b, p: (0, 0)),
                pl.BlockSpec((1, S, hid), lambda b, p: (b, 0, 0)),
                pl.BlockSpec((1, S, 1), lambda b, p: (b, 0, 0)),
            ],
            out_specs=[
                pl.BlockSpec((1, J, tp), lambda b, p: (b, 0, p)),
                pl.BlockSpec((1, S, tp), lambda b, p: (b, 0, p)),
            ],
        ),
        compiler_params=pltpu.CompilerParams(
            dimension_semantics=("parallel", "parallel"),
            vmem_limit_bytes=vmem_limit),
    )(x, w1t, b1t, w2t, b2t, w2c, b2c)

    if not channels_last:
        return jac_cp.reshape(B, J, H, W), flow_cp.reshape(B, S, H, W)

    # JacobianNetOutput convention (channel-last).  Note: this transpose
    # re-reads/re-writes the jacobian; use channels_last=False to avoid it.
    jacobian = jnp.transpose(jac_cp.reshape(B, J, H, W), (0, 2, 3, 1))
    flow = jnp.transpose(flow_cp.reshape(B, S, H, W), (0, 2, 3, 1))
    return jacobian, flow


def _reference(input_img, input_cmd, w1, b1, w2, b2, spatial_dim):
    B, C, H, W = input_img.shape
    cmd_dim = input_cmd.shape[1]
    x = jnp.transpose(input_img, (0, 2, 3, 1))                     # (B,H,W,C)
    h = jnp.maximum(jnp.einsum("bhwc,cd->bhwd", x, w1,
                               precision=jax.lax.Precision.HIGHEST) + b1, 0.0)
    jac = jnp.einsum("bhwd,dj->bhwj", h, w2,
                     precision=jax.lax.Precision.HIGHEST) + b2     # (B,H,W,J)
    jac_r = jac.reshape(B, H, W, spatial_dim, cmd_dim)
    flow = jnp.einsum("bhwsc,bc->bhws", jac_r, input_cmd,
                      precision=jax.lax.Precision.HIGHEST)
    return jac, flow


if __name__ == "__main__":
    key = jax.random.PRNGKey(0)
    k_img, k_cmd, k_w1, k_b1, k_w2, k_b2 = jax.random.split(key, 6)

    B, C, H, W = 2, 4, 16, 16
    cmd_dim = 8
    spatial_dim = 2
    hidden = 32
    jacobian_dim = spatial_dim * cmd_dim

    input_img = jax.random.normal(k_img, (B, C, H, W), dtype=jnp.float32)
    input_cmd = jax.random.normal(k_cmd, (B, cmd_dim), dtype=jnp.float32)

    # Deterministic synthetic parameters (equivalent to two 1x1 convs).
    w1 = 0.1 * jax.random.normal(k_w1, (C, hidden), dtype=jnp.float32)
    b1 = 0.1 * jax.random.normal(k_b1, (hidden,), dtype=jnp.float32)
    w2 = 0.1 * jax.random.normal(k_w2, (hidden, jacobian_dim), dtype=jnp.float32)
    b2 = 0.1 * jax.random.normal(k_b2, (jacobian_dim,), dtype=jnp.float32)

    jac_ref, flow_ref = _reference(input_img, input_cmd, w1, b1, w2, b2,
                                   spatial_dim)

    # f32 path: validates the kernel pipeline tightly against the reference.
    jac32, flow32 = jacobian_field_forward(
        input_img, input_cmd, w1, b1, w2, b2,
        spatial_dim=spatial_dim, compute_dtype=jnp.float32)
    jax.block_until_ready((jac32, flow32))
    assert jac32.shape == (B, H, W, jacobian_dim)
    assert flow32.shape == (B, H, W, spatial_dim)
    assert jnp.allclose(jac32, jac_ref, atol=1e-4, rtol=1e-4)
    assert jnp.allclose(flow32, flow_ref, atol=1e-4, rtol=1e-4)

    # bf16 fast path (default): f32 accumulation, looser tolerance.
    jac, flow = jacobian_field_forward(
        input_img, input_cmd, w1, b1, w2, b2, spatial_dim=spatial_dim)
    jax.block_until_ready((jac, flow))
    assert jac.shape == (B, H, W, jacobian_dim)
    assert flow.shape == (B, H, W, spatial_dim)
    assert jnp.allclose(jac, jac_ref, atol=2e-2, rtol=2e-2)
    assert jnp.allclose(flow, flow_ref, atol=2e-2, rtol=2e-2)

    print("KERNEL_OK")
</pallas_src>

<mosaic_0001>
module attributes {stable_mosaic.version = 11 : i64} {
  func.func @_jacobian_field_kernel(%arg0: i32, %arg1: i32, %arg2: memref<1x4x256xf32, #tpu.memory_space<vmem>>, %arg3: memref<32x4xf32, #tpu.memory_space<vmem>>, %arg4: memref<32x1xf32, #tpu.memory_space<vmem>>, %arg5: memref<16x32xf32, #tpu.memory_space<vmem>>, %arg6: memref<16x1xf32, #tpu.memory_space<vmem>>, %arg7: memref<1x2x32xf32, #tpu.memory_space<vmem>>, %arg8: memref<1x2x1xf32, #tpu.memory_space<vmem>>, %arg9: memref<1x16x256xf32, #tpu.memory_space<vmem>>, %arg10: memref<1x2x256xf32, #tpu.memory_space<vmem>>) attributes {dimension_semantics = [#tpu.dimension_semantics<parallel>, #tpu.dimension_semantics<parallel>], iteration_bounds = array<i64: 2, 1>, scalar_prefetch = 0 : i64, scratch_operands = 0 : i64, tpu.core_type = #tpu.core_type<tc>, window_params = [{transform_indices = @transform_0, window_bounds = array<i64: 1, 4, 256>}, {pipeline_mode = #tpu.pipeline_mode<synchronous>, transform_indices = @transform_1, window_bounds = array<i64: 32, 4>}, {pipeline_mode = #tpu.pipeline_mode<synchronous>, transform_indices = @transform_2, window_bounds = array<i64: 32, 1>}, {pipeline_mode = #tpu.pipeline_mode<synchronous>, transform_indices = @transform_3, window_bounds = array<i64: 16, 32>}, {pipeline_mode = #tpu.pipeline_mode<synchronous>, transform_indices = @transform_4, window_bounds = array<i64: 16, 1>}, {transform_indices = @transform_5, window_bounds = array<i64: 1, 2, 32>}, {transform_indices = @transform_6, window_bounds = array<i64: 1, 2, 1>}, {transform_indices = @transform_7, window_bounds = array<i64: 1, 16, 256>}, {transform_indices = @transform_8, window_bounds = array<i64: 1, 2, 256>}]} {
    %c0 = arith.constant 0 : index
    %c0_0 = arith.constant 0 : index
    %c0_1 = arith.constant 0 : index
    %0 = vector.load %arg2[%c0, %c0_0, %c0_1] : memref<1x4x256xf32, #tpu.memory_space<vmem>>, vector<1x4x256xf32>
    %1 = vector.shape_cast %0 : vector<1x4x256xf32> to vector<4x256xf32>
    %c0_2 = arith.constant 0 : index
    %c0_3 = arith.constant 0 : index
    %2 = vector.load %arg3[%c0_2, %c0_3] : memref<32x4xf32, #tpu.memory_space<vmem>>, vector<32x4xf32>
    %cst = arith.constant dense<0.000000e+00> : vector<32x256xf32>
    %3 = tpu.matmul %2, %1, %cst {dimension_numbers = #tpu.dot_dimension_numbers<[1], [0], [0], [1], [0, 0, 1, 1], [], []>} : vector<32x4xf32>, vector<4x256xf32>, vector<32x256xf32> -> vector<32x256xf32>
    %c0_4 = arith.constant 0 : index
    %c0_5 = arith.constant 0 : index
    %4 = vector.load %arg4[%c0_4, %c0_5] : memref<32x1xf32, #tpu.memory_space<vmem>>, vector<32x1xf32>
    %5 = vector.broadcast %4 : vector<32x1xf32> to vector<32x256xf32>
    %6 = arith.addf %3, %5 : vector<32x256xf32>
    %cst_6 = arith.constant 0.000000e+00 : f32
    %7 = vector.broadcast %cst_6 : f32 to vector<32x256xf32>
    %8 = arith.maximumf %6, %7 : vector<32x256xf32>
    %c0_7 = arith.constant 0 : index
    %c0_8 = arith.constant 0 : index
    %9 = vector.load %arg5[%c0_7, %c0_8] : memref<16x32xf32, #tpu.memory_space<vmem>>, vector<16x32xf32>
    %cst_9 = arith.constant dense<0.000000e+00> : vector<16x256xf32>
    %10 = tpu.matmul %9, %8, %cst_9 {dimension_numbers = #tpu.dot_dimension_numbers<[1], [0], [0], [1], [0, 0, 1, 1], [], []>} : vector<16x32xf32>, vector<32x256xf32>, vector<16x256xf32> -> vector<16x256xf32>
    %c0_10 = arith.constant 0 : index
    %c0_11 = arith.constant 0 : index
    %11 = vector.load %arg6[%c0_10, %c0_11] : memref<16x1xf32, #tpu.memory_space<vmem>>, vector<16x1xf32>
    %12 = vector.broadcast %11 : vector<16x1xf32> to vector<16x256xf32>
    %13 = arith.addf %10, %12 : vector<16x256xf32>
    %c0_12 = arith.constant 0 : index
    %c0_13 = arith.constant 0 : index
    %c0_14 = arith.constant 0 : index
    %14 = vector.load %arg9[%c0_12, %c0_13, %c0_14] : memref<1x16x256xf32, #tpu.memory_space<vmem>>, vector<1x16x256xf32>
    %15 = vector.shape_cast %14 : vector<1x16x256xf32> to vector<16x256xf32>
    %16 = vector.shape_cast %13 : vector<16x256xf32> to vector<1x16x256xf32>
    tpu.vector_store %arg9[%c0_12, %c0_13, %c0_14], %16 {strides = array<i32>} : memref<1x16x256xf32, #tpu.memory_space<vmem>>, vector<1x16x256xf32>,
    %c0_15 = arith.constant 0 : index
    %c0_16 = arith.constant 0 : index
    %c0_17 = arith.constant 0 : index
    %17 = vector.load %arg7[%c0_15, %c0_16, %c0_17] : memref<1x2x32xf32, #tpu.memory_space<vmem>>, vector<1x2x32xf32>
    %18 = vector.shape_cast %17 : vector<1x2x32xf32> to vector<2x32xf32>
    %cst_18 = arith.constant dense<0.000000e+00> : vector<2x256xf32>
    %19 = tpu.matmul %18, %8, %cst_18 {dimension_numbers = #tpu.dot_dimension_numbers<[1], [0], [0], [1], [0, 0, 1, 1], [], []>} : vector<2x32xf32>, vector<32x256xf32>, vector<2x256xf32> -> vector<2x256xf32>
    %c0_19 = arith.constant 0 : index
    %c0_20 = arith.constant 0 : index
    %c0_21 = arith.constant 0 : index
    %20 = vector.load %arg8[%c0_19, %c0_20, %c0_21] : memref<1x2x1xf32, #tpu.memory_space<vmem>>, vector<1x2x1xf32>
    %21 = vector.shape_cast %20 : vector<1x2x1xf32> to vector<2x1xf32>
    %22 = vector.broadcast %21 : vector<2x1xf32> to vector<2x256xf32>
    %23 = arith.addf %19, %22 : vector<2x256xf32>
    %c0_22 = arith.constant 0 : index
    %c0_23 = arith.constant 0 : index
    %c0_24 = arith.constant 0 : index
    %24 = vector.load %arg10[%c0_22, %c0_23, %c0_24] : memref<1x2x256xf32, #tpu.memory_space<vmem>>, vector<1x2x256xf32>
    %25 = vector.shape_cast %24 : vector<1x2x256xf32> to vector<2x256xf32>
    %26 = vector.shape_cast %23 : vector<2x256xf32> to vector<1x2x256xf32>
    tpu.vector_store %arg10[%c0_22, %c0_23, %c0_24], %26 {strides = array<i32>} : memref<1x2x256xf32, #tpu.memory_space<vmem>>, vector<1x2x256xf32>,
    return
  }
  func.func @transform_0(%arg0: i32, %arg1: i32) -> (i32, i32, i32) {
    %c0_i32 = arith.constant 0 : i32
    %c0_i32_0 = arith.constant 0 : i32
    return %arg0, %c0_i32, %arg1 : i32, i32, i32
  }
  func.func @transform_1(%arg0: i32, %arg1: i32) -> (i32, i32) {
    %c0_i32 = arith.constant 0 : i32
    %c0_i32_0 = arith.constant 0 : i32
    %c0_i32_1 = arith.constant 0 : i32
    return %c0_i32, %c0_i32_0 : i32, i32
  }
  func.func @transform_2(%arg0: i32, %arg1: i32) -> (i32, i32) {
    %c0_i32 = arith.constant 0 : i32
    %c0_i32_0 = arith.constant 0 : i32
    %c0_i32_1 = arith.constant 0 : i32
    return %c0_i32, %c0_i32_0 : i32, i32
  }
  func.func @transform_3(%arg0: i32, %arg1: i32) -> (i32, i32) {
    %c0_i32 = arith.constant 0 : i32
    %c0_i32_0 = arith.constant 0 : i32
    %c0_i32_1 = arith.constant 0 : i32
    return %c0_i32, %c0_i32_0 : i32, i32
  }
  func.func @transform_4(%arg0: i32, %arg1: i32) -> (i32, i32) {
    %c0_i32 = arith.constant 0 : i32
    %c0_i32_0 = arith.constant 0 : i32
    %c0_i32_1 = arith.constant 0 : i32
    return %c0_i32, %c0_i32_0 : i32, i32
  }
  func.func @transform_5(%arg0: i32, %arg1: i32) -> (i32, i32, i32) {
    %c0_i32 = arith.constant 0 : i32
    %c0_i32_0 = arith.constant 0 : i32
    %c0_i32_1 = arith.constant 0 : i32
    return %arg0, %c0_i32, %c0_i32_0 : i32, i32, i32
  }
  func.func @transform_6(%arg0: i32, %arg1: i32) -> (i32, i32, i32) {
    %c0_i32 = arith.constant 0 : i32
    %c0_i32_0 = arith.constant 0 : i32
    %c0_i32_1 = arith.constant 0 : i32
    return %arg0, %c0_i32, %c0_i32_0 : i32, i32, i32
  }
  func.func @transform_7(%arg0: i32, %arg1: i32) -> (i32, i32, i32) {
    %c0_i32 = arith.constant 0 : i32
    %c0_i32_0 = arith.constant 0 : i32
    return %arg0, %c0_i32, %arg1 : i32, i32, i32
  }
  func.func @transform_8(%arg0: i32, %arg1: i32) -> (i32, i32, i32) {
    %c0_i32 = arith.constant 0 : i32
    %c0_i32_0 = arith.constant 0 : i32
    return %arg0, %c0_i32, %arg1 : i32, i32, i32
  }
}

</mosaic_0001>

<bundles_post_ra>
// kernel: jacobian_field_forward.1
= control target key start
LH: loop header
LB: loop body
LE: loop exit
PB: predicated region body
PF: predicated region fallthrough
CT: control target
= control target key end

     0   :  { %s1049_s27 = smov 0   ;;  %s1051_s28 = smov 0   ;;  %s1148_s0 = inlined_call_operand.vmem [shape: f32[2,4,256], index: 0, kind: input, shape index: {}]   ;;  %s1149_s1 = inlined_call_operand.vmem [shape: f32[32,4], index: 1, kind: input, shape index: {}]   ;;  %s1150_s2 = inlined_call_operand.vmem [shape: f32[32,1], index: 2, kind: input, shape index: {}]   ;;  %s1151_s3 = inlined_call_operand.vmem [shape: f32[16,32], index: 3, kind: input, shape index: {}]   ;;  %s1152_s4 = inlined_call_operand.vmem [shape: f32[16,1], index: 4, kind: input, shape index: {}]   ;;  %s1153_s5 = inlined_call_operand.vmem [shape: f32[2,2,32], index: 5, kind: input, shape index: {}]   ;;  %s1154_s6 = inlined_call_operand.vmem [shape: f32[2,2,1], index: 6, kind: input, shape index: {}]   ;;  %s1155_s7 = inlined_call_operand.vmem [shape: f32[2,16,256], index: 7, kind: output, shape index: {0}]   ;;  %s1156_s8 = inlined_call_operand.vmem [shape: f32[2,2,256], index: 8, kind: output, shape index: {1}]  }
   0x1   :  { %s1053_s29 = smov 0  }
   0x2 LB: > { %s31_s30 = sadd.s32 1, %s996_s28  ;;  %p909_p0 = scmp.ge.s32.totalorder %s1000_s29, 1  ;;  %s1000_s29 = sphi %s1053_s29, %s19_s29   ;;  %s996_s28 = sphi %s1051_s28, %s1158_s28   ;;  %s992_s27 = sphi %s1049_s27, %s1157_s27  }
   0x3   : > { %p33_p1 = scmp.ge.s32.totalorder %s31_s30, 2  ;;  %p306_p2 = scmp.lt.s32.totalorder %s1000_s29, 3 }
   0x5   : > { %s1160_s30 = smov (%p33_p1, %s31_s30), 0  ;;  %p307_p3 = pnand %p909_p0, %p306_p2 }
   0x6   : > { %p366_p4 = scmp.lt.s32.totalorder (!%p307_p3), %s992_s27, 1  ;;  %v1002_v0 = vmov (!%p307_p3), 0.0   ;;  %v408_v1 = vld [vmem:[%s1150_s2] sm:$0xff] (!%p307_p3)  ;;  %v1003_v2 = vmov (!%p307_p3), 0   ;;  %v410_v3 = vld [vmem:[%s1150_s2 + $0x10] sm:$0xff] (!%p307_p3)  ;;  %v409_v4 = vld [vmem:[%s1150_s2 + $0x8] sm:$0xff] (!%p307_p3) }
   0x7   : > { %310 = sbr.rel (%p307_p3) target bundleno = 483 (0x1e3), region = 48  ;;  %516 = vmatprep.mubr.f32.mxu0 (!%p307_p3), %v1002_v0  ;;  %634 = vmatprep.mubr.f32.mxu1 (!%p307_p3), %v1002_v0  ;;  %v411_v5 = vld [vmem:[%s1150_s2 + $0x18] sm:$0xff] (!%p307_p3)  ;;  %vm447_vm0 = vcmask (!%p307_p3), 1043456   ;;  %v404_v8 = vld [vmem:[%s1149_s1] sm:$0xff] (!%p307_p3)  ;;  %vm434_vm1 = vcmask (!%p307_p3), 31744   ;;  %v405_v11 = vld [vmem:[%s1149_s1 + $0x8] sm:$0xff] (!%p307_p3) }
   0x8   : > { %975 = vset.pattern.permute.xlu0 (!%p307_p3), %v1003_v2  ;;  %976 = vset.pattern.permute.xlu1 (!%p307_p3), %v1003_v2  ;;  %v551_v10 = vld [vmem:[%s1152_s4] sm:$0xff] (!%p307_p3)  ;;  %v552_v12 = vld [vmem:[%s1152_s4 + $0x8] sm:$0xff] (!%p307_p3)  ;;  %v406_v13 = vld [vmem:[%s1149_s1 + $0x10] sm:$0xff] (!%p307_p3)  ;;  %vm563_vm2 = vcmask (!%p307_p3), 261120  }
   0x9   : > { %414 = vperm.xlu0 (!%p307_p3), %975, %v408_v1   ;;  %424 = vperm.xlu1 (!%p307_p3), %976, %v410_v3   ;;  %v407_v14 = vld [vmem:[%s1149_s1 + $0x18] sm:$0xff] (!%p307_p3)  ;;  %v549_v47 = vld [vmem:[%s1151_s3] sm:$0xff] (!%p307_p3)  ;;  %v550_v48 = vld [vmem:[%s1151_s3 + $0x8] sm:$0xff] (!%p307_p3) }
   0xd   : > { %419 = vperm.xlu0 (!%p307_p3), %975, %v409_v4   ;;  %429 = vperm.xlu1 (!%p307_p3), %976, %v411_v5  }
   0xe   : > { %s1162_s27 = smov (!%p366_p4, %s992_s27), 1 }
   0xf   : > { %s930_s13 = sshll.u32 %s1162_s27, 3  ;;  %s912_s16 = sshll.u32 %s1162_s27, 1 }
  0x10   : > { %s373_s21 = scalar_lea.vmem %s1148_s0, %s930_s13  ;;  %s382_s24 = scalar_lea.vmem %s1154_s6, %s912_s16 }
  0x11   : > { %v403_v6 = vld [vmem:[%s373_s21] sm:$0xff]  ;;  %555 = vperm.xlu1 %976, %v551_v10   ;;  %s378_s26 = scalar_lea.vmem %s1153_s5, %s912_s16  ;;  %s931_s9 = sshll.u32 %s1162_s27, 5 }
  0x12   : > { %v433_v7 = vcombine.high %v403_v6, %v403_v6  ;;  %v652_v9 = vld [vmem:[%s382_s24] sm:$0x3]  ;;  %s391_s12 = scalar_lea.vmem %s1155_s7, %s931_s9  ;;  %s932_s16 = sshll.u32 %s1162_s27, 2 }
  0x13   : > { %655 = vperm.xlu0 %975, %v652_v9   ;;  %v651_v49 = vld [vmem:[%s378_s26] sm:$0x3]  ;;  %s401_s15 = scalar_lea.vmem %s1156_s8, %s932_s16 }
  0x14   : > { %918 = vmatprep.subr.msk.mxu0 %vm447_vm0, %v433_v7 }
  0x15   : > { %919 = vmatpush1.msk.msra.mxu0 %vm447_vm0, %v403_v6 }
  0x16   : > { %920 = vmatmul.mubr.msk.f32.vlgmr.msra.gmra.mrb[0].mxu0 %vm434_vm1, %v404_v8 }
  0x17   : > { %522 = vmatprep.mubr.f32.mxu0 %v1002_v0  ;;  %560 = vperm.xlu0 %975, %v552_v12  }
  0x1a   : > { %921 = vmatmul.mubr.msk.f32.gmra.mrb[2].mxu0 %vm434_vm1, %v405_v11 }
  0x1b   : > { %528 = vmatprep.mubr.f32.mxu0 %v1002_v0 }
  0x1e   : > { %922 = vmatmul.mubr.msk.f32.gmra.mrb[4].mxu0 %vm434_vm1, %v406_v13 }
  0x1f   : > { %534 = vmatprep.mubr.f32.mxu0 %v1002_v0 }
  0x22   : > { %923 = vmatmul.mubr.msk.f32.gmra.mrb[6].mxu0 %vm434_vm1, %v407_v14 }
  0x88   : > { %v415_v15 = vpop.permute.xlu0 %414  ;;  %v425_v24 = vpop.permute.xlu1 %424 }
  0x8c   : > { %v420_v19 = vpop.permute.xlu0 %419  ;;  %v430_v35 = vpop.permute.xlu1 %429 }
  0x90   : > { %v556_v51 = vpop.permute.xlu1 %555 }
  0x92   : > { %v656_v50 = vpop.permute.xlu0 %655 }
  0x96   : > { %v561_v56 = vpop.permute.xlu0 %560 }
  0xe9   : > { %v518_v16 = vpop.f32.mrb[0].mxu0 }
  0xea   : > { %v520_v17 = vpop.f32.mrb[1].mxu0  ;;  %v519_v18 = vadd.f32 %v518_v16, %v415_v15 }
  0xeb   : > { %v521_v20 = vadd.f32 %v520_v17, %v415_v15 }
  0xec   : > { %v541_v26 = vmax.f32 %v519_v18, 0.0 }
  0xed   : > { %v524_v21 = vpop.f32.mrb[2].mxu0  ;;  %v542_v28 = vmax.f32 %v521_v20, 0.0 }
  0xee   : > { %v525_v22 = vadd.f32 %v524_v21, %v420_v19  ;;  %v526_v23 = vpop.f32.mrb[3].mxu0 }
  0xef   : > { %v527_v25 = vadd.f32 %v526_v23, %v420_v19 }
  0xf0   : > { %v543_v27 = vmax.f32 %v525_v22, 0.0 }
  0xf1   : > { %v544_v29 = vmax.f32 %v527_v25, 0.0  ;;  %v530_v30 = vpop.f32.mrb[4].mxu0 }
  0xf2   : > { %v532_v31 = vpop.f32.mrb[5].mxu0  ;;  %v935_v32 = vpack.c.bf16 %v543_v27, %v541_v26  ;;  %v531_v34 = vadd.f32 %v530_v30, %v425_v24 }
  0xf3   : > { %v933_v33 = vpack.c.bf16 %v544_v29, %v542_v28  ;;  %v533_v36 = vadd.f32 %v532_v31, %v425_v24 }
  0xf4   : > { %v545_v41 = vmax.f32 %v531_v34, 0.0 }
  0xf5   : > { %v536_v37 = vpop.f32.mrb[6].mxu0  ;;  %934 = vmatprep.subr.bf16.mxu1 %v933_v33  ;;  %v546_v43 = vmax.f32 %v533_v36, 0.0 }
  0xf6   : > { %v537_v38 = vadd.f32 %v536_v37, %v430_v35  ;;  %v538_v39 = vpop.f32.mrb[7].mxu0  ;;  %936 = vmatpush1.bf16.msra.mxu1 %v935_v32 }
  0xf7   : > { %v539_v40 = vadd.f32 %v538_v39, %v430_v35 }
  0xf8   : > { %v547_v42 = vmax.f32 %v537_v38, 0.0 }
  0xf9   : > { %v548_v44 = vmax.f32 %v539_v40, 0.0 }
  0xfa   : > { %v939_v45 = vpack.c.bf16 %v547_v42, %v545_v41 }
  0xfb   : > { %v937_v46 = vpack.c.bf16 %v548_v44, %v546_v43 }
  0xfd   : > { %938 = vmatprep.subr.bf16.mxu1 %v937_v46 }
  0xfe   : > { %940 = vmatpush1.bf16.msra.mxu1 %v939_v45 }
  0xff   : > { %942 = vmatprep.subr.bf16.mxu1 %v933_v33 }
 0x101   : > { %924 = vmatmul.mubr.msk.f32.vlgmr.msra.gmra.mrb[0].mxu1 %vm563_vm2, %v549_v47 }
 0x102   : > { %944 = vmatpush1.bf16.msra.mxu1 %v935_v32  ;;  %640 = vmatprep.mubr.f32.mxu1 %v1002_v0 }
 0x103   : > { %946 = vmatprep.subr.bf16.mxu1 %v937_v46 }
 0x105   : > { %925 = vmatmul.mubr.msk.f32.gmra.mrb[2].mxu1 %vm563_vm2, %v550_v48 }
 0x106   : > { %948 = vmatpush1.bf16.msra.mxu1 %v939_v45  ;;  %725 = vmatprep.mubr.f32.mxu1 %v1002_v0 }
 0x109   : > { %926 = vmatmul.mubr.msk.f32.vlgmr.msra.gmra.mrb[4].mxu1 %vm563_vm2, %v651_v49 }
 0x1d4   : > { %v636_v52 = vpop.f32.mrb[0].mxu1 }
 0x1d5   : > { %v637_v53 = vadd.f32 %v636_v52, %v556_v51  ;;  %v638_v54 = vpop.f32.mrb[1].mxu1 }
 0x1d6   : > { %v639_v55 = vadd.f32 %v638_v54, %v556_v51 }
 0x1d7   : > { %647 = vst [vmem:[%s391_s12] sm:$0xff] %v637_v53 }
 0x1d8   : > { %648 = vst [vmem:[%s391_s12 + $0x8] sm:$0xff] %v639_v55  ;;  %v642_v57 = vpop.f32.mrb[2].mxu1 }
 0x1d9   : > { %v643_v58 = vadd.f32 %v642_v57, %v561_v56  ;;  %v644_v59 = vpop.f32.mrb[3].mxu1 }
 0x1da   : > { %v645_v60 = vadd.f32 %v644_v59, %v561_v56 }
 0x1db   : > { %649 = vst [vmem:[%s391_s12 + $0x10] sm:$0xff] %v643_v58 }
 0x1dc   : > { %650 = vst [vmem:[%s391_s12 + $0x18] sm:$0xff] %v645_v60  ;;  %v727_v61 = vpop.f32.mrb[4].mxu1 }
 0x1dd   : > { %v728_v62 = vadd.f32 %v727_v61, %v656_v50  ;;  %v729_v63 = vpop.f32.mrb[5].mxu1 }
 0x1de   : > { %v730_v0 = vadd.f32 %v729_v63, %v656_v50 }
 0x1e0   : > { %v734_v1 = vcombine.low %v728_v62, %v730_v0 }
 0x1e2   : > { %927 = vst.sshfl [vmem:[%s401_s15] sm:$0x33 pattern:$0x76325410] %v734_v1 }
 0x1e3 PF: > { %s19_s29 = sadd.s32 1, %s1000_s29   ;;  %s1157_s27 = smov %s996_s28 }
 0x1e4   : > { %p16_p5 = scmp.ge.s32.totalorder %s19_s29, 4   ;;  %s1158_s28 = smov %s1160_s30 }
 0x1e6   :  { %18 = sbr.rel (!%p16_p5) target bundleno = 2 (0x2), region = 96 }

</bundles_post_ra>
